<compile_context>
chip_gen: v7x
topology: tpu7x:2x2x1
jax: 0.10.0
libtpu: 0.0.40
codegen_flags: <defaults>
</compile_context>

<pallas_src>
import functools

import jax
import jax.numpy as jnp
from jax.experimental import pallas as pl
from jax.experimental.pallas import tpu as pltpu

SMOOTH = 1e-6
LANES = 128
SUBLANES = 8
MAX_TILE_ROWS = 4096    # (4096, 128) f32 = 2 MiB per input block
SUB_ROWS = 512          # in-kernel sub-chunk: bounds temps / vreg pressure


def _round_up(a: int, m: int) -> int:
    return ((a + m - 1) // m) * m


def _iou_kernel(o_ref, t_ref, inter_ref, union_ref, *,
                rows, tile_rows, sub_rows, need_mask):
    pid = pl.program_id(0)

    @pl.when(pid == 0)
    def _init():
        inter_ref[...] = jnp.zeros_like(inter_ref)
        union_ref[...] = jnp.zeros_like(union_ref)

    num_sub = tile_rows // sub_rows

    def accumulate(masked):
        def body(i, carry):
            start = pl.multiple_of(i * sub_rows, sub_rows)
            # Threshold in the input's native dtype (matches PyTorch `> 0.5`).
            o_b = o_ref[pl.ds(start, sub_rows), :] > 0.5
            t_b = t_ref[pl.ds(start, sub_rows), :] > 0.5
            inter_b = jnp.logical_and(o_b, t_b)
            union_b = jnp.logical_or(o_b, t_b)
            if masked:
                # Only the boundary tile runs this branch (gated by pl.when):
                # mask rows beyond the true row count (partial last tile and
                # the unspecified OOB region of the boundary DMA block).
                row0 = pid * tile_rows + i * sub_rows
                local = jax.lax.broadcasted_iota(jnp.int32, (sub_rows, LANES), 0)
                valid = (row0 + local) < rows
                inter_b = jnp.logical_and(inter_b, valid)
                union_b = jnp.logical_and(union_b, valid)
            # vreg-wise accumulation (pure VPU adds); no per-step XLU reduce.
            inter_ref[...] += jnp.sum(
                inter_b.astype(jnp.float32).reshape(-1, SUBLANES, LANES), axis=0)
            union_ref[...] += jnp.sum(
                union_b.astype(jnp.float32).reshape(-1, SUBLANES, LANES), axis=0)
            return carry
        jax.lax.fori_loop(0, num_sub, body, 0)

    if need_mask:
        last = pl.num_programs(0) - 1

        @pl.when(pid != last)
        def _fast():
            accumulate(False)

        @pl.when(pid == last)
        def _masked():
            accumulate(True)
    else:
        accumulate(False)


def iou_score(outputs: jax.Array, targets: jax.Array, smooth: float = SMOOTH,
              max_tile_rows: int = MAX_TILE_ROWS) -> jax.Array:
    assert outputs.shape == targets.shape, "outputs/targets must have same shape"
    o = outputs.reshape(-1)   # free for contiguous arrays; native dtype kept
    t = targets.reshape(-1)
    n = o.shape[0]
    if n == 0:
        return jnp.float32(1.0)

    if n % LANES != 0:
        # Rare ragged fallback: pad only to the next lane multiple (<128 zero
        # elements; zeros threshold to False so they contribute nothing).
        pad = LANES - (n % LANES)
        o = jnp.pad(o, (0, pad))
        t = jnp.pad(t, (0, pad))

    rows = o.shape[0] // LANES
    o2 = o.reshape(rows, LANES)
    t2 = t.reshape(rows, LANES)

    # Sublane packing multiple for the dtype (f32 -> 8, bf16 -> 16, int8 -> 32).
    itemsize = int(jnp.dtype(o2.dtype).itemsize)
    packing = SUBLANES * max(1, 4 // max(1, itemsize))

    tile_rows = min(_round_up(max_tile_rows, packing), _round_up(rows, packing))
    sub_rows = SUB_ROWS if tile_rows % SUB_ROWS == 0 else tile_rows

    num_tiles = pl.cdiv(rows, tile_rows)
    need_mask = (rows % tile_rows) != 0

    kernel = functools.partial(
        _iou_kernel, rows=rows, tile_rows=tile_rows, sub_rows=sub_rows,
        need_mask=need_mask)

    cost = pl.CostEstimate(
        flops=6 * n,
        transcendentals=0,
        bytes_accessed=2 * n * itemsize + 2 * SUBLANES * LANES * 4,
    )

    inter_slots, union_slots = pl.pallas_call(
        kernel,
        out_shape=(
            jax.ShapeDtypeStruct((SUBLANES, LANES), jnp.float32),
            jax.ShapeDtypeStruct((SUBLANES, LANES), jnp.float32),
        ),
        grid_spec=pltpu.PrefetchScalarGridSpec(
            num_scalar_prefetch=0,
            grid=(num_tiles,),
            in_specs=[
                pl.BlockSpec((tile_rows, LANES), lambda i: (i, 0)),
                pl.BlockSpec((tile_rows, LANES), lambda i: (i, 0)),
            ],
            out_specs=[
                pl.BlockSpec((SUBLANES, LANES), lambda i: (0, 0)),
                pl.BlockSpec((SUBLANES, LANES), lambda i: (0, 0)),
            ],
        ),
        compiler_params=pltpu.CompilerParams(
            dimension_semantics=("arbitrary",),
            vmem_limit_bytes=32 * 1024 * 1024,
        ),
        cost_estimate=cost,
    )(o2, t2)

    # Tiny final reduction + smooth in plain JAX.
    intersection = jnp.sum(inter_slots)
    union = jnp.sum(union_slots)
    return (intersection + smooth) / (union + smooth)


def iou_score_ref(outputs, targets, smooth=SMOOTH):
    o = (outputs > 0.5).astype(jnp.float32).reshape(-1)
    t = (targets > 0.5).astype(jnp.float32).reshape(-1)
    inter = jnp.sum(o * t)
    union = jnp.sum(o) + jnp.sum(t) - inter
    return (inter + smooth) / (union + smooth)


if __name__ == "__main__":
    key = jax.random.PRNGKey(0)
    k1, k2, k3, k4 = jax.random.split(key, 4)

    # Small NCHW-like prediction / target maps in [0, 1].
    outputs = jax.random.uniform(k1, (2, 4, 16, 16), dtype=jnp.float32)
    targets = jax.random.uniform(k2, (2, 4, 16, 16), dtype=jnp.float32)
    iou = iou_score(outputs, targets)
    jax.block_until_ready(iou)
    ref = iou_score_ref(outputs, targets)
    assert jnp.allclose(iou, ref, rtol=1e-5, atol=1e-6), (iou, ref)

    # Medium, non-tile-aligned case: rows=5880 -> two 4096-row tiles, the
    # second partial, exercising the masked boundary path (no wrapper pad).
    outputs2 = jax.random.uniform(k3, (5, 3, 224, 224), dtype=jnp.float32)
    targets2 = jax.random.uniform(k4, (5, 3, 224, 224), dtype=jnp.float32)
    iou2 = iou_score(outputs2, targets2)
    jax.block_until_ready(iou2)
    ref2 = iou_score_ref(outputs2, targets2)
    assert jnp.allclose(iou2, ref2, rtol=1e-5, atol=1e-6), (iou2, ref2)

    print("KERNEL_OK")
</pallas_src>

<mosaic_0001>
module attributes {stable_mosaic.version = 11 : i64} {
  func.func @_iou_kernel(%arg0: i32, %arg1: memref<16x128xf32, #tpu.memory_space<vmem>>, %arg2: memref<16x128xf32, #tpu.memory_space<vmem>>, %arg3: memref<8x128xf32, #tpu.memory_space<vmem>>, %arg4: memref<8x128xf32, #tpu.memory_space<vmem>>) attributes {dimension_semantics = [#tpu.dimension_semantics<arbitrary>], iteration_bounds = array<i64: 1>, scalar_prefetch = 0 : i64, scratch_operands = 0 : i64, tpu.core_type = #tpu.core_type<tc>, window_params = [{transform_indices = @transform_0, window_bounds = array<i64: 16, 128>}, {transform_indices = @transform_1, window_bounds = array<i64: 16, 128>}, {pipeline_mode = #tpu.pipeline_mode<synchronous>, transform_indices = @transform_2, window_bounds = array<i64: 8, 128>}, {pipeline_mode = #tpu.pipeline_mode<synchronous>, transform_indices = @transform_3, window_bounds = array<i64: 8, 128>}]} {
    %c0_i32 = arith.constant 0 : i32
    %0 = arith.cmpi eq, %arg0, %c0_i32 : i32
    %1 = arith.extui %0 : i1 to i32
    %c0_i32_0 = arith.constant 0 : i32
    %2 = arith.cmpi ne, %1, %c0_i32_0 : i32
    scf.if %2 {
      %cst_14 = arith.constant 0.000000e+00 : f32
      %29 = vector.broadcast %cst_14 : f32 to vector<8x128xf32>
      %c0_15 = arith.constant 0 : index
      %c0_16 = arith.constant 0 : index
      %30 = vector.load %arg3[%c0_15, %c0_16] : memref<8x128xf32, #tpu.memory_space<vmem>>, vector<8x128xf32>
      tpu.vector_store %arg3[%c0_15, %c0_16], %29 {strides = array<i32>} : memref<8x128xf32, #tpu.memory_space<vmem>>, vector<8x128xf32>,
      %cst_17 = arith.constant 0.000000e+00 : f32
      %31 = vector.broadcast %cst_17 : f32 to vector<8x128xf32>
      %c0_18 = arith.constant 0 : index
      %c0_19 = arith.constant 0 : index
      %32 = vector.load %arg4[%c0_18, %c0_19] : memref<8x128xf32, #tpu.memory_space<vmem>>, vector<8x128xf32>
      tpu.vector_store %arg4[%c0_18, %c0_19], %31 {strides = array<i32>} : memref<8x128xf32, #tpu.memory_space<vmem>>, vector<8x128xf32>,
    } else {
    }
    %c0_i32_1 = arith.constant 0 : i32
    %c16_i32 = arith.constant 16 : i32
    %3 = arith.muli %c0_i32_1, %c16_i32 : i32
    %4 = tpu.assume_multiple %3, 16 : i32
    %5 = arith.index_cast %4 : i32 to index
    %c0 = arith.constant 0 : index
    %6 = vector.load %arg1[%5, %c0] : memref<16x128xf32, #tpu.memory_space<vmem>>, vector<16x128xf32>
    %cst = arith.constant 5.000000e-01 : f32
    %7 = vector.broadcast %cst : f32 to vector<16x128xf32>
    %8 = arith.cmpf ogt, %6, %7 : vector<16x128xf32>
    %9 = arith.index_cast %4 : i32 to index
    %c0_2 = arith.constant 0 : index
    %10 = vector.load %arg2[%9, %c0_2] : memref<16x128xf32, #tpu.memory_space<vmem>>, vector<16x128xf32>
    %cst_3 = arith.constant 5.000000e-01 : f32
    %11 = vector.broadcast %cst_3 : f32 to vector<16x128xf32>
    %12 = arith.cmpf ogt, %10, %11 : vector<16x128xf32>
    %13 = arith.andi %8, %12 : vector<16x128xi1>
    %14 = arith.ori %8, %12 : vector<16x128xi1>
    %c0_4 = arith.constant 0 : index
    %c0_5 = arith.constant 0 : index
    %15 = vector.load %arg3[%c0_4, %c0_5] : memref<8x128xf32, #tpu.memory_space<vmem>>, vector<8x128xf32>
    %16 = arith.extui %13 : vector<16x128xi1> to vector<16x128xi32>
    %17 = arith.sitofp %16 : vector<16x128xi32> to vector<16x128xf32>
    %18 = vector.shape_cast %17 : vector<16x128xf32> to vector<2x8x128xf32>
    %cst_6 = arith.constant dense<0.000000e+00> : vector<8x128xf32>
    %19 = vector.multi_reduction <add>, %18, %cst_6 [0] : vector<2x8x128xf32> to vector<8x128xf32>
    %20 = arith.addf %15, %19 : vector<8x128xf32>
    %c0_7 = arith.constant 0 : index
    %c0_8 = arith.constant 0 : index
    %21 = vector.load %arg3[%c0_7, %c0_8] : memref<8x128xf32, #tpu.memory_space<vmem>>, vector<8x128xf32>
    tpu.vector_store %arg3[%c0_7, %c0_8], %20 {strides = array<i32>} : memref<8x128xf32, #tpu.memory_space<vmem>>, vector<8x128xf32>,
    %c0_9 = arith.constant 0 : index
    %c0_10 = arith.constant 0 : index
    %22 = vector.load %arg4[%c0_9, %c0_10] : memref<8x128xf32, #tpu.memory_space<vmem>>, vector<8x128xf32>
    %23 = arith.extui %14 : vector<16x128xi1> to vector<16x128xi32>
    %24 = arith.sitofp %23 : vector<16x128xi32> to vector<16x128xf32>
    %25 = vector.shape_cast %24 : vector<16x128xf32> to vector<2x8x128xf32>
    %cst_11 = arith.constant dense<0.000000e+00> : vector<8x128xf32>
    %26 = vector.multi_reduction <add>, %25, %cst_11 [0] : vector<2x8x128xf32> to vector<8x128xf32>
    %27 = arith.addf %22, %26 : vector<8x128xf32>
    %c0_12 = arith.constant 0 : index
    %c0_13 = arith.constant 0 : index
    %28 = vector.load %arg4[%c0_12, %c0_13] : memref<8x128xf32, #tpu.memory_space<vmem>>, vector<8x128xf32>
    tpu.vector_store %arg4[%c0_12, %c0_13], %27 {strides = array<i32>} : memref<8x128xf32, #tpu.memory_space<vmem>>, vector<8x128xf32>,
    %c1_i32 = arith.constant 1 : i32
    return
  }
  func.func @transform_0(%arg0: i32) -> (i32, i32) {
    %c0_i32 = arith.constant 0 : i32
    %c0_i32_0 = arith.constant 0 : i32
    return %arg0, %c0_i32 : i32, i32
  }
  func.func @transform_1(%arg0: i32) -> (i32, i32) {
    %c0_i32 = arith.constant 0 : i32
    %c0_i32_0 = arith.constant 0 : i32
    return %arg0, %c0_i32 : i32, i32
  }
  func.func @transform_2(%arg0: i32) -> (i32, i32) {
    %c0_i32 = arith.constant 0 : i32
    %c0_i32_0 = arith.constant 0 : i32
    %c0_i32_1 = arith.constant 0 : i32
    return %c0_i32, %c0_i32_0 : i32, i32
  }
  func.func @transform_3(%arg0: i32) -> (i32, i32) {
    %c0_i32 = arith.constant 0 : i32
    %c0_i32_0 = arith.constant 0 : i32
    %c0_i32_1 = arith.constant 0 : i32
    return %c0_i32, %c0_i32_0 : i32, i32
  }
}

</mosaic_0001>

<bundles_post_ra>
// kernel: tpu_custom_call.1
= control target key start
LH: loop header
LB: loop body
LE: loop exit
PB: predicated region body
PF: predicated region fallthrough
CT: control target
= control target key end

     0   :  { %9 = vsyncpa [#allocation3], 0  ;;  %s289_s0 = inlined_call_operand.hbm [shape: f32[16,128], index: 0, kind: input, shape index: {}]   ;;  %s290_s1 = inlined_call_operand.hbm [shape: f32[16,128], index: 1, kind: input, shape index: {}]   ;;  %s291_s2 = inlined_call_operand.hbm [shape: f32[8,128], index: 2, kind: output, shape index: {0}]   ;;  %s292_s3 = inlined_call_operand.hbm [shape: f32[8,128], index: 3, kind: output, shape index: {1}]  }
   0x1   :  { %10 = vsyncpa [#allocation6], 0 }
   0x2   :  { %11 = vsyncpa [#allocation4], 0 }
   0x3   :  { %12 = vsyncpa [#allocation9], 0  ;;  %s214_s12 = smov [#allocation2]   ;;  %s118_s16 = scalar_lea.hbm %s289_s0, 256 }
   0x4   :  { %s18_s13 = sshll.u32 %s214_s12, 4  ;;  %p119_p0 = scmp.ne.s32.totalorder %s289_s0, %s118_s16  ;;  %s19_s13 = int_to_ptr.vmem [resolvable:$true] %s18_s13 }
   0x5   :  { %p122_p1 = scmp.lt.u32.totalorder %s118_s16, %s289_s0 }
   0x7   :  { %p124_p2 = pnand %p122_p1, %p119_p0 }
   0x9   :  { %127 = shalt.err (!%p124_p2)
}
   0xa   :  { %s128_s21 = scalar_lea.vmem %s19_s13, 256  ;;  %p133_p4 = scmp.lt.s32.totalorder %s19_s13, %s19_s13 }
   0xb   :  { %p129_p3 = scmp.ne.s32.totalorder %s19_s13, %s128_s21  ;;  %p134_p5 = scmp.lt.s32.totalorder %s128_s21, %s128_s21 }
   0xd   :  { %p135_p6 = por %p134_p5, %p133_p4 }
   0xf   :  { %p136_p7 = pnand %p135_p6, %p129_p3 }
  0x11   :  { %139 = shalt.err (!%p136_p7)
}
  0x12   :  { %s215_s22 = smov 128   ;;  %s216_s23 = smov 8  }
  0x13   :  { %24 = dma.hbm_to_vmem [thread:$0]  %s289_s0, 256, %s19_s13, [#allocation3], %s215_s22, %s215_s22, %s216_s23  }
  0x14   :  { %s217_s26 = smov [#allocation5]   ;;  %s140_s30 = scalar_lea.hbm %s290_s1, 256 }
  0x15   :  { %s30_s27 = sshll.u32 %s217_s26, 4  ;;  %p141_p8 = scmp.ne.s32.totalorder %s290_s1, %s140_s30  ;;  %s31_s27 = int_to_ptr.vmem [resolvable:$true] %s30_s27 }
  0x16   :  { %p144_p9 = scmp.lt.u32.totalorder %s140_s30, %s290_s1 }
  0x18   :  { %p146_p10 = pnand %p144_p9, %p141_p8 }
  0x1a   :  { %149 = shalt.err (!%p146_p10)
}
  0x1b   :  { %s150_s8 = scalar_lea.vmem %s31_s27, 256  ;;  %p155_p12 = scmp.lt.s32.totalorder %s31_s27, %s31_s27 }
  0x1c   :  { %p151_p11 = scmp.ne.s32.totalorder %s31_s27, %s150_s8  ;;  %p156_p13 = scmp.lt.s32.totalorder %s150_s8, %s150_s8 }
  0x1e   :  { %p157_p0 = por %p156_p13, %p155_p12 }
  0x20   :  { %p158_p1 = pnand %p157_p0, %p151_p11 }
  0x22   :  { %161 = shalt.err (!%p158_p1)
}
  0x23   :  { %36 = dma.hbm_to_vmem [thread:$0]  %s290_s1, 256, %s31_s27, [#allocation6], %s215_s22, %s215_s22, %s216_s23  }
  0x24   :  { %206 = dma.done.wait [#allocation3], 256  }
  0x25   :  { %207 = vsyncadd [#allocation3], 4294967040 }
  0x26   :  { %208 = dma.done.wait [#allocation6], 256  }
  0x27   :  { %209 = vsyncadd [#allocation6], 4294967040  ;;  %v49_v0 = vld [vmem:[#allocation2] sm:$0xff]  ;;  %v50_v1 = vld [vmem:[#allocation2 + $0x8] sm:$0xff]  ;;  %v218_v4 = vmov 0.0   ;;  %s219_s10 = smov [#allocation7]  }
  0x28   :  { %v53_v2 = vld [vmem:[#allocation5] sm:$0xff]  ;;  %vm51_vm0 = vcmp.gt.f32.partialorder %v49_v0, 0.5  ;;  %vm52_vm1 = vcmp.gt.f32.partialorder %v50_v1, 0.5  ;;  %v54_v3 = vld [vmem:[#allocation5 + $0x8] sm:$0xff]  ;;  %s83_s1 = sshll.u32 %s219_s10, 4  ;;  %s220_s11 = smov [#allocation8]   ;;  %s84_s1 = int_to_ptr.vmem [resolvable:$true] %s83_s1 }
  0x29   :  { %vm55_vm2 = vcmp.gt.f32.partialorder %v53_v2, 0.5  ;;  %vm56_vm3 = vcmp.gt.f32.partialorder %v54_v3, 0.5  ;;  %s93_s12 = sshll.u32 %s220_s11, 4  ;;  %s162_s13 = scalar_lea.vmem %s84_s1, 128  ;;  %s94_s12 = int_to_ptr.vmem [resolvable:$true] %s93_s12 }
  0x2a   :  { %vm57_vm4 = vmand %vm51_vm0, %vm55_vm2  ;;  %p163_p2 = scmp.ne.s32.totalorder %s84_s1, %s162_s13  ;;  %p167_p3 = scmp.lt.s32.totalorder %s84_s1, %s84_s1 }
  0x2b   :  { %vm58_vm5 = vmand %vm52_vm1, %vm56_vm3  ;;  %v107_v5 = vsel %vm57_vm4, 1.0, %v218_v4  ;;  %p168_p4 = scmp.lt.s32.totalorder %s162_s13, %s162_s13 }
  0x2c   :  { %v108_v6 = vsel %vm58_vm5, 1.0, %v218_v4  ;;  %vm59_vm6 = vmor %vm51_vm0, %vm55_vm2 }
  0x2d   :  { %v66_v7 = vadd.f32 %v108_v6, %v107_v5  ;;  %vm60_vm7 = vmor %vm52_vm1, %vm56_vm3  ;;  %v109_v8 = vsel %vm59_vm6, 1.0, %v218_v4  ;;  %p169_p5 = por %p168_p4, %p167_p3 }
  0x2e   :  { %v110_v9 = vsel %vm60_vm7, 1.0, %v218_v4 }
  0x2f   :  { %v74_v10 = vadd.f32 %v110_v9, %v109_v8  ;;  %68 = vst [vmem:[#allocation7] sm:$0xff] %v66_v7  ;;  %p170_p6 = pnand %p169_p5, %p163_p2 }
  0x31   :  { %173 = shalt.err (!%p170_p6)
}
  0x32   :  { %s174_s16 = scalar_lea.hbm %s291_s2, 128 }
  0x33   :  { %p175_p7 = scmp.ne.s32.totalorder %s291_s2, %s174_s16  ;;  %p178_p8 = scmp.lt.u32.totalorder %s174_s16, %s291_s2 }
  0x35   :  { %p180_p9 = pnand %p178_p8, %p175_p7 }
  0x37   :  { %183 = shalt.err (!%p180_p9)
}
  0x38   :  { %86 = dma.vmem_to_hbm [thread:$0]  %s84_s1, 128, %s291_s2, [#allocation4]   ;;  %76 = vst [vmem:[#allocation8] sm:$0xff] %v74_v10 }
  0x39   :  { %s184_s23 = scalar_lea.vmem %s94_s12, 128  ;;  %p189_p11 = scmp.lt.s32.totalorder %s94_s12, %s94_s12 }
  0x3a   :  { %p185_p10 = scmp.ne.s32.totalorder %s94_s12, %s184_s23  ;;  %p190_p12 = scmp.lt.s32.totalorder %s184_s23, %s184_s23 }
  0x3c   :  { %p191_p13 = por %p190_p12, %p189_p11 }
  0x3e   :  { %p192_p0 = pnand %p191_p13, %p185_p10 }
  0x40   :  { %195 = shalt.err (!%p192_p0)
}
  0x41   :  { %s196_s26 = scalar_lea.hbm %s292_s3, 128 }
  0x42   :  { %p197_p1 = scmp.ne.s32.totalorder %s292_s3, %s196_s26  ;;  %p200_p2 = scmp.lt.u32.totalorder %s196_s26, %s292_s3 }
  0x44   :  { %p202_p3 = pnand %p200_p2, %p197_p1 }
  0x46   :  { %205 = shalt.err (!%p202_p3)
}
  0x47   :  { %96 = dma.vmem_to_hbm [thread:$0]  %s94_s12, 128, %s292_s3, [#allocation9]  }
  0x48   :  { %210 = dma.done.wait [#allocation4], 128  }
  0x49   :  { %211 = vsyncadd [#allocation4], 4294967168 }
  0x4a   :  { %212 = dma.done.wait [#allocation9], 128  }
  0x4b   :  { %213 = vsyncadd [#allocation9], 4294967168 }
  0x4c   :  { %103 = vsyncpa [#allocation3], 1 }
  0x4d   :  { %104 = vsyncpa [#allocation6], 1 }
  0x4e   :  { %105 = vsyncpa [#allocation4], 1 }
  0x4f   :  { %106 = vsyncpa [#allocation9], 1 }

</bundles_post_ra>
